<compile_context>
chip_gen: v7x
topology: tpu7x:2x2x1
jax: 0.10.0
libtpu: 0.0.40
codegen_flags: <defaults>
</compile_context>

<pallas_src>
import functools

import jax
import jax.numpy as jnp
from jax import lax
from jax.experimental import pallas as pl
from jax.experimental.pallas import tpu as pltpu


def _round_up(x, m):
    return (x + m - 1) // m * m


def _vmem_capacity_bytes():
    """Physical VMEM per core; conservative fallback (v7x = 64 MiB) if unavailable."""
    try:
        cap = int(pltpu.get_tpu_info().vmem_capacity_bytes)
        if cap > 0:
            return cap
    except Exception:
        pass
    return 64 * 1024 * 1024


def _conv1d_kernel(xl_ref, xm_ref, xr_ref, w_ref, b_ref, o_ref, *,
                   K, dilation, pad, ext, l_tile, halo_blk, l_valid,
                   out_blk_l, l_axis, mask_main, fuse_taps, compute_dtype):
    # xl/xm/xr: (1, C_in, halo_blk / l_tile / halo_blk) windows of the UNPADDED x.
    # w_ref: (C_out_t, K*C_in) if fuse_taps else (K, C_out_t, C_in)
    # b_ref: (C_out_t, 1)   o_ref: (1, C_out_t, out_blk_l)
    j = pl.program_id(l_axis)

    # ---- main tile --------------------------------------------------------
    xm = xm_ref[0]                                           # (C_in, l_tile)
    if mask_main:
        # Statically enabled only when some main block can read past l_valid
        # (ragged trailing block): zero those undefined columns.
        col = lax.broadcasted_iota(jnp.int32, xm.shape, 1)
        xm = jnp.where(j * l_tile + col < l_valid, xm, jnp.zeros_like(xm))
    xm = xm.astype(compute_dtype)

    # ---- narrow halo strips (masked unconditionally; cheap) ---------------
    rpad = ext - pad
    ls = None
    rs = None
    if pad > 0:
        ls = xl_ref[0, :, halo_blk - pad:]                   # (C_in, pad)
        # Left halo columns map to x positions j*l_tile - pad + c; they are only
        # out of range (pos < 0) when j == 0 (clamped left block).
        ls = jnp.where(j > 0, ls, jnp.zeros_like(ls)).astype(compute_dtype)
    if rpad > 0:
        rs = xr_ref[0, :, :rpad]                             # (C_in, ext-pad)
        # Right halo column c maps to x position (j+1)*l_tile + c; can exceed
        # l_valid even on non-last tiles (partial/clamped halo block) -> mask.
        rcol = lax.broadcasted_iota(jnp.int32, rs.shape, 1)
        rs = jnp.where((j + 1) * l_tile + rcol < l_valid, rs, jnp.zeros_like(rs))
        rs = rs.astype(compute_dtype)

    def tap(k):
        off = k * dilation - pad
        if off == 0:
            return xm                                        # centre tap: no shift
        if off < 0:
            s = -off
            return jnp.concatenate([ls[:, pad - s:], xm[:, :l_tile - s]], axis=1)
        s = off
        return jnp.concatenate([xm[:, s:], rs[:, :s]], axis=1)

    if fuse_taps:
        # Small C_in: stack K taps along the contraction dim -> one deep MXU dot.
        stack = jnp.concatenate([tap(k) for k in range(K)], axis=0)   # (K*C_in, l_tile)
        acc = jnp.dot(w_ref[...], stack, preferred_element_type=jnp.float32)
    else:
        # C_in >= 128: per-tap contraction is already MXU-deep; skip the stack copy.
        acc = jnp.dot(w_ref[0], tap(0), preferred_element_type=jnp.float32)
        for k in range(1, K):
            acc = acc + jnp.dot(w_ref[k], tap(k), preferred_element_type=jnp.float32)

    acc = acc + b_ref[...]                                    # bias add in f32 (VPU)
    o_ref[0] = acc[:, :out_blk_l].astype(o_ref.dtype)


def conv1d_pallas(x, weight, bias, *, dilation=1, compute_dtype=None):
    """1-D conv matching the PyTorch module. x:(N,C_in,L) w:(C_out,C_in,K) b:(C_out,)."""
    N, C_in, L = x.shape
    C_out, C_in_w, K = weight.shape
    assert C_in_w == C_in
    ext = dilation * (K - 1)
    pad = ext // 2
    L_out = L + 2 * pad - ext            # PyTorch Conv1d output length for padding=pad
    if compute_dtype is None:
        compute_dtype = x.dtype          # keep module numerics; pass bf16 explicitly for MXU speed

    # Halo block: one lane-aligned chunk large enough for either one-sided halo.
    halo_blk = max(128, _round_up(max(pad, ext - pad, 1), 128))
    x_eff, L_eff = x, L
    if L_eff < halo_blk:                 # tiny inputs only: pad up to one lane-aligned block
        x_eff = jnp.pad(x, ((0, 0), (0, 0), (0, halo_blk - L_eff)))
        L_eff = halo_blk

    xb = jnp.dtype(x.dtype).itemsize
    cb = jnp.dtype(compute_dtype).itemsize

    # C_out tiling (second-minor dim of the output block must be a multiple of 8 or full).
    if C_out > 256 and C_out % 256 == 0:
        c_out_t = 256
    else:
        c_out_t = C_out

    fuse_taps = C_in < 128               # deep-contraction fusion only pays off for small C_in

    # ---- VMEM-budget driven length tile ------------------------------------
    vmem_cap = _vmem_capacity_bytes()
    vmem_limit = max(32 << 20, min(vmem_cap - (8 << 20), 96 << 20))   # v7x ~56MiB, v5e/v6e 96MiB
    vmem_budget = vmem_limit // 2        # headroom for compiler scratch / temporaries

    per_col = (2 * C_in * xb             # main x block (double-buffered)
               + 2 * c_out_t * xb        # output block (double-buffered)
               + 4 * c_out_t             # f32 accumulator
               + (K if fuse_taps else 2) * C_in * cb)   # tap / stack temporaries
    fixed = (4 * C_in * halo_blk * xb    # two halo streams (double-buffered)
             + 2 * c_out_t * K * C_in * cb              # weight block (double-buffered)
             + 2 * c_out_t * 4)                          # bias
    r_budget = max(1, int((vmem_budget - fixed) // (per_col * halo_blk)))
    r_need = pl.cdiv(L_out, halo_blk)                    # blocks needed to cover the output
    r_cap = max(1, L_eff // halo_blk)                    # keep main blocks starting in-bounds
    r_max = max(1, 4096 // halo_blk)                     # diminishing returns beyond ~4K lanes
    r = max(1, min(r_budget, r_need, r_cap, r_max))
    l_tile = r * halo_blk

    n_l = pl.cdiv(L_out, l_tile)
    n_hblk = pl.cdiv(L_eff, halo_blk)
    n_co = C_out // c_out_t

    # v7x has 2 TensorCores: if the grid collapses to one step, split C_out so both
    # cores get work (keeps lane-dense output stores; only shrinks VMEM footprint).
    if N == 1 and n_l == 1 and n_co == 1 and C_out >= 16 and C_out % 16 == 0:
        c_out_t = C_out // 2
        n_co = 2

    mask_main = (n_l * l_tile) > L_eff                   # statically skip when impossible
    out_blk_l = l_tile if n_l > 1 else L_out             # single tile -> full-dim output block

    # Weight / bias layouts matched to the chosen matmul strategy.
    KC = K * C_in
    if fuse_taps:
        # (C_out, C_in, K) -> (C_out, K*C_in); row order [tap0 | tap1 | ...] matches the stack.
        w_arr = jnp.transpose(weight, (0, 2, 1)).reshape(C_out, KC).astype(compute_dtype)
    else:
        w_arr = jnp.transpose(weight, (2, 0, 1)).astype(compute_dtype)   # (K, C_out, C_in)
    b_arr = bias.astype(jnp.float32).reshape(C_out, 1)

    # ---- grid order: keep the larger redundant stream resident --------------
    act_reread = (n_co - 1) * C_in * L_eff * xb          # extra activation reads if co is outer
    w_reread = (n_l - 1) * C_out * KC * cb               # extra weight reads if co is inner
    co_inner = (n_co > 1) and (act_reread > w_reread)

    if co_inner:                                          # grid = (N, L tiles, C_out tiles)
        grid = (N, n_l, n_co)
        l_axis = 1
        xl_map = lambda n, j, co: (n, 0, jnp.maximum(j * r - 1, 0))
        xm_map = lambda n, j, co: (n, 0, j)
        xr_map = lambda n, j, co: (n, 0, jnp.minimum((j + 1) * r, n_hblk - 1))
        w_map2 = lambda n, j, co: (co, 0)
        w_map3 = lambda n, j, co: (0, co, 0)
        b_map = lambda n, j, co: (co, 0)
        o_map = lambda n, j, co: (n, co, j)
    else:                                                 # grid = (N, C_out tiles, L tiles)
        grid = (N, n_co, n_l)
        l_axis = 2
        xl_map = lambda n, co, j: (n, 0, jnp.maximum(j * r - 1, 0))
        xm_map = lambda n, co, j: (n, 0, j)
        xr_map = lambda n, co, j: (n, 0, jnp.minimum((j + 1) * r, n_hblk - 1))
        w_map2 = lambda n, co, j: (co, 0)
        w_map3 = lambda n, co, j: (0, co, 0)
        b_map = lambda n, co, j: (co, 0)
        o_map = lambda n, co, j: (n, co, j)

    w_spec = (pl.BlockSpec((c_out_t, KC), w_map2) if fuse_taps
              else pl.BlockSpec((K, c_out_t, C_in), w_map3))

    kernel = functools.partial(
        _conv1d_kernel, K=K, dilation=dilation, pad=pad, ext=ext,
        l_tile=l_tile, halo_blk=halo_blk, l_valid=L_eff, out_blk_l=out_blk_l,
        l_axis=l_axis, mask_main=mask_main, fuse_taps=fuse_taps,
        compute_dtype=compute_dtype)

    out = pl.pallas_call(
        kernel,
        out_shape=jax.ShapeDtypeStruct((N, C_out, L_out), x.dtype),
        grid_spec=pltpu.PrefetchScalarGridSpec(
            num_scalar_prefetch=0,
            grid=grid,
            in_specs=[
                # left neighbour halo block (clamped at the left edge; masked in-kernel)
                pl.BlockSpec((1, C_in, halo_blk), xl_map),
                # main tile
                pl.BlockSpec((1, C_in, l_tile), xm_map),
                # right neighbour halo block (clamped at the right edge; masked in-kernel)
                pl.BlockSpec((1, C_in, halo_blk), xr_map),
                # weight / bias: block index only changes with the C_out-tile axis
                w_spec,
                pl.BlockSpec((c_out_t, 1), b_map),
            ],
            out_specs=pl.BlockSpec((1, c_out_t, out_blk_l), o_map),
        ),
        compiler_params=pltpu.CompilerParams(
            dimension_semantics=("parallel", "parallel", "parallel"),
            vmem_limit_bytes=int(vmem_limit),
        ),
    )(x_eff, x_eff, x_eff, w_arr, b_arr)

    return out


def make_params(key, in_channels, out_channels, kernel_size):
    """Deterministic init mirroring the module: kaiming_normal_ weight, default bias."""
    kw, kb = jax.random.split(key)
    fan_in = in_channels * kernel_size
    std = (2.0 / fan_in) ** 0.5                     # kaiming_normal_, fan_in, gain=sqrt(2)
    weight = std * jax.random.normal(
        kw, (out_channels, in_channels, kernel_size), dtype=jnp.float32)
    bound = 1.0 / (fan_in ** 0.5)                   # PyTorch Conv1d default bias init
    bias = jax.random.uniform(
        kb, (out_channels,), minval=-bound, maxval=bound, dtype=jnp.float32)
    return weight, bias


def _torch_conv1d_ref(x, weight, bias, dilation):
    K = weight.shape[-1]
    pad = dilation * (K - 1) // 2
    out = lax.conv_general_dilated(
        x, weight, window_strides=(1,), padding=[(pad, pad)],
        rhs_dilation=(dilation,), dimension_numbers=("NCH", "OIH", "NCH"))
    return out + bias[None, :, None]


if __name__ == "__main__":
    key = jax.random.PRNGKey(0)

    cases = [
        # (N, C_in, C_out, L,    K, dilation, compute_dtype, tol)
        (2, 4, 8, 16, 3, 1, None, 1e-4),              # tiny shapes from the module spec
        (2, 16, 32, 896, 3, 2, None, 1e-4),           # dilation>1, single big tile
        (2, 4, 8, 16, 2, 1, None, 1e-4),              # even effective kernel -> L_out = L-1
        (1, 16, 32, 1024, 5, 1, jnp.bfloat16, 1e-1),  # bf16 MXU, f32 acc, C_out split for 2 TCs
        (2, 8, 16, 1300, 5, 2, None, 1e-4),           # ragged L: multi-tile + partial out block
        (1, 128, 128, 512, 3, 1, None, 1e-4),         # C_in>=128 -> per-tap accumulated dots
    ]
    for idx, (N, C_in, C_out, L, K, dil, cdt, tol) in enumerate(cases):
        key, kx, kp = jax.random.split(key, 3)
        x = jax.random.normal(kx, (N, C_in, L), dtype=jnp.float32)
        weight, bias = make_params(kp, C_in, C_out, K)

        out = conv1d_pallas(x, weight, bias, dilation=dil, compute_dtype=cdt)
        out = jax.block_until_ready(out)

        ref = _torch_conv1d_ref(x, weight, bias, dil)
        assert out.shape == ref.shape, (idx, out.shape, ref.shape)
        assert bool(jnp.allclose(out, ref, atol=tol, rtol=tol)), (
            idx, float(jnp.max(jnp.abs(out - ref))))

    print("KERNEL_OK")
</pallas_src>

<mosaic_0001>
module attributes {stable_mosaic.version = 11 : i64} {
  func.func @_conv1d_kernel(%arg0: i32, %arg1: i32, %arg2: i32, %arg3: memref<1x4x128xf32, #tpu.memory_space<vmem>>, %arg4: memref<1x4x128xf32, #tpu.memory_space<vmem>>, %arg5: memref<1x4x128xf32, #tpu.memory_space<vmem>>, %arg6: memref<8x12xf32, #tpu.memory_space<vmem>>, %arg7: memref<8x1xf32, #tpu.memory_space<vmem>>, %arg8: memref<1x8x16xf32, #tpu.memory_space<vmem>>) attributes {dimension_semantics = [#tpu.dimension_semantics<parallel>, #tpu.dimension_semantics<parallel>, #tpu.dimension_semantics<parallel>], iteration_bounds = array<i64: 2, 1, 1>, scalar_prefetch = 0 : i64, scratch_operands = 0 : i64, tpu.core_type = #tpu.core_type<tc>, window_params = [{transform_indices = @transform_0, window_bounds = array<i64: 1, 4, 128>}, {transform_indices = @transform_1, window_bounds = array<i64: 1, 4, 128>}, {transform_indices = @transform_2, window_bounds = array<i64: 1, 4, 128>}, {transform_indices = @transform_3, window_bounds = array<i64: 8, 12>}, {transform_indices = @transform_4, window_bounds = array<i64: 8, 1>}, {transform_indices = @transform_5, window_bounds = array<i64: 1, 8, 16>}]} {
    %c0 = arith.constant 0 : index
    %c0_0 = arith.constant 0 : index
    %c0_1 = arith.constant 0 : index
    %0 = vector.load %arg4[%c0, %c0_0, %c0_1] : memref<1x4x128xf32, #tpu.memory_space<vmem>>, vector<1x4x128xf32>
    %1 = vector.shape_cast %0 : vector<1x4x128xf32> to vector<4x128xf32>
    %c0_2 = arith.constant 0 : index
    %c0_3 = arith.constant 0 : index
    %c127 = arith.constant 127 : index
    %2 = vector.load %arg3[%c0_2, %c0_3, %c127] : memref<1x4x128xf32, #tpu.memory_space<vmem>>, vector<1x4x1xf32>
    %3 = vector.shape_cast %2 : vector<1x4x1xf32> to vector<4x1xf32>
    %c0_i32 = arith.constant 0 : i32
    %4 = arith.cmpi sgt, %arg2, %c0_i32 : i32
    %cst = arith.constant 0.000000e+00 : f32
    %5 = vector.broadcast %cst : f32 to vector<4x1xf32>
    %6 = arith.select %4, %3, %5 : vector<4x1xf32>
    %c0_4 = arith.constant 0 : index
    %c0_5 = arith.constant 0 : index
    %c0_6 = arith.constant 0 : index
    %7 = vector.load %arg5[%c0_4, %c0_5, %c0_6] : memref<1x4x128xf32, #tpu.memory_space<vmem>>, vector<1x4x1xf32>
    %8 = vector.shape_cast %7 : vector<1x4x1xf32> to vector<4x1xf32>
    %9 = tpu.iota {dimensions = array<i32: 1>} : vector<4x1xi32>
    %c1_i32 = arith.constant 1 : i32
    %10 = arith.addi %arg2, %c1_i32 : i32
    %c128_i32 = arith.constant 128 : i32
    %11 = arith.muli %10, %c128_i32 : i32
    %12 = vector.broadcast %11 : i32 to vector<4x1xi32>
    %13 = arith.addi %12, %9 : vector<4x1xi32>
    %c128_i32_7 = arith.constant 128 : i32
    %14 = vector.broadcast %c128_i32_7 : i32 to vector<4x1xi32>
    %15 = arith.cmpi slt, %13, %14 : vector<4x1xi32>
    %cst_8 = arith.constant 0.000000e+00 : f32
    %16 = vector.broadcast %cst_8 : f32 to vector<4x1xf32>
    %17 = arith.select %15, %8, %16 : vector<4x1xi1>, vector<4x1xf32>
    %18 = vector.extract_strided_slice %1 {offsets = [0, 0], sizes = [4, 127], strides = [1, 1]} : vector<4x128xf32> to vector<4x127xf32>
    %19 = tpu.concatenate %6, %18 in 1 : vector<4x1xf32>, vector<4x127xf32> -> vector<4x128xf32>
    %20 = vector.extract_strided_slice %1 {offsets = [0, 1], sizes = [4, 127], strides = [1, 1]} : vector<4x128xf32> to vector<4x127xf32>
    %21 = tpu.concatenate %20, %17 in 1 : vector<4x127xf32>, vector<4x1xf32> -> vector<4x128xf32>
    %22 = tpu.concatenate %19, %1, %21 in 0 : vector<4x128xf32>, vector<4x128xf32>, vector<4x128xf32> -> vector<12x128xf32>
    %c0_9 = arith.constant 0 : index
    %c0_10 = arith.constant 0 : index
    %23 = vector.load %arg6[%c0_9, %c0_10] : memref<8x12xf32, #tpu.memory_space<vmem>>, vector<8x12xf32>
    %cst_11 = arith.constant dense<0.000000e+00> : vector<8x128xf32>
    %24 = tpu.matmul %23, %22, %cst_11 {dimension_numbers = #tpu.dot_dimension_numbers<[1], [0], [0], [1], [0, 0, 1, 1], [], []>} : vector<8x12xf32>, vector<12x128xf32>, vector<8x128xf32> -> vector<8x128xf32>
    %c0_12 = arith.constant 0 : index
    %c0_13 = arith.constant 0 : index
    %25 = vector.load %arg7[%c0_12, %c0_13] : memref<8x1xf32, #tpu.memory_space<vmem>>, vector<8x1xf32>
    %26 = vector.broadcast %25 : vector<8x1xf32> to vector<8x128xf32>
    %27 = arith.addf %24, %26 : vector<8x128xf32>
    %28 = vector.extract_strided_slice %27 {offsets = [0, 0], sizes = [8, 16], strides = [1, 1]} : vector<8x128xf32> to vector<8x16xf32>
    %c0_14 = arith.constant 0 : index
    %c0_15 = arith.constant 0 : index
    %c0_16 = arith.constant 0 : index
    %29 = vector.load %arg8[%c0_14, %c0_15, %c0_16] : memref<1x8x16xf32, #tpu.memory_space<vmem>>, vector<1x8x16xf32>
    %30 = vector.shape_cast %29 : vector<1x8x16xf32> to vector<8x16xf32>
    %31 = vector.shape_cast %28 : vector<8x16xf32> to vector<1x8x16xf32>
    tpu.vector_store %arg8[%c0_14, %c0_15, %c0_16], %31 {strides = array<i32>} : memref<1x8x16xf32, #tpu.memory_space<vmem>>, vector<1x8x16xf32>,
    return
  }
  func.func @transform_0(%arg0: i32, %arg1: i32, %arg2: i32) -> (i32, i32, i32) {
    %c1_i32 = arith.constant 1 : i32
    %0 = arith.muli %arg2, %c1_i32 : i32
    %c1_i32_0 = arith.constant 1 : i32
    %1 = arith.subi %0, %c1_i32_0 : i32
    %c0_i32 = arith.constant 0 : i32
    %2 = arith.maxsi %1, %c0_i32 : i32
    %c0_i32_1 = arith.constant 0 : i32
    %c0_i32_2 = arith.constant 0 : i32
    return %arg0, %c0_i32_1, %2 : i32, i32, i32
  }
  func.func @transform_1(%arg0: i32, %arg1: i32, %arg2: i32) -> (i32, i32, i32) {
    %c0_i32 = arith.constant 0 : i32
    %c0_i32_0 = arith.constant 0 : i32
    return %arg0, %c0_i32, %arg2 : i32, i32, i32
  }
  func.func @transform_2(%arg0: i32, %arg1: i32, %arg2: i32) -> (i32, i32, i32) {
    %c1_i32 = arith.constant 1 : i32
    %0 = arith.addi %arg2, %c1_i32 : i32
    %c1_i32_0 = arith.constant 1 : i32
    %1 = arith.muli %0, %c1_i32_0 : i32
    %c0_i32 = arith.constant 0 : i32
    %2 = arith.minsi %1, %c0_i32 : i32
    %c0_i32_1 = arith.constant 0 : i32
    %c0_i32_2 = arith.constant 0 : i32
    return %arg0, %c0_i32_1, %2 : i32, i32, i32
  }
  func.func @transform_3(%arg0: i32, %arg1: i32, %arg2: i32) -> (i32, i32) {
    %c0_i32 = arith.constant 0 : i32
    %c0_i32_0 = arith.constant 0 : i32
    return %arg1, %c0_i32 : i32, i32
  }
  func.func @transform_4(%arg0: i32, %arg1: i32, %arg2: i32) -> (i32, i32) {
    %c0_i32 = arith.constant 0 : i32
    %c0_i32_0 = arith.constant 0 : i32
    return %arg1, %c0_i32 : i32, i32
  }
  func.func @transform_5(%arg0: i32, %arg1: i32, %arg2: i32) -> (i32, i32, i32) {
    %c0_i32 = arith.constant 0 : i32
    return %arg0, %arg1, %arg2 : i32, i32, i32
  }
}

</mosaic_0001>

<bundles_post_ra>
// kernel: tpu_custom_call.1
= control target key start
LH: loop header
LB: loop body
LE: loop exit
PB: predicated region body
PF: predicated region fallthrough
CT: control target
= control target key end

     0   :  { %10 = vsyncpa [#allocation3], 0  ;;  %s1215_s0 = inlined_call_operand.vmem [shape: f32[2,4,128], index: 0, kind: input, shape index: {}]   ;;  %s1216_s1 = inlined_call_operand.hbm [shape: f32[2,4,128], index: 1, kind: input, shape index: {}]   ;;  %s1217_s2 = inlined_call_operand.vmem [shape: f32[2,4,128], index: 2, kind: input, shape index: {}]   ;;  %s1218_s3 = inlined_call_operand.hbm [shape: f32[8,12], index: 3, kind: input, shape index: {}]   ;;  %s1219_s4 = inlined_call_operand.vmem [shape: f32[8,1], index: 4, kind: input, shape index: {}]   ;;  %s1220_s5 = inlined_call_operand.hbm [shape: f32[2,8,16], index: 5, kind: output, shape index: {}]  }
   0x1   :  { %12 = vsyncpa [#allocation3 + $0x1], 0 }
   0x2   :  { %13 = vsyncpa [#allocation6], 0 }
   0x3   :  { %14 = vsyncpa [#allocation4], 0 }
   0x4   :  { %16 = vsyncpa [#allocation4 + $0x1], 0  ;;  %s995_s0 = smov 0   ;;  %s997_s18 = smov 0  }
   0x5   :  { %s999_s19 = smov 0   ;;  %s1001_s2 = smov 0  }
   0x6   :  { %s1003_s20 = smov 0   ;;  %s1005_s21 = smov 0  }
   0x7 LB: > { %s683_s22 = sadd.s32 4294967295, %s953_s21   ;;  %s684_s23 = sadd.s32 4294967294, %s953_s21   ;;  %s953_s21 = sphi %s1005_s21, %s22_s21   ;;  %s949_s20 = sphi %s1003_s20, %s1245_s20   ;;  %s945_s2 = sphi %s1001_s2, %s1244_s2   ;;  %s941_s19 = sphi %s999_s19, %s1243_s19   ;;  %s937_s18 = sphi %s997_s18, %s1242_s18   ;;  %s933_s0 = sphi %s995_s0, %s1241_s0  }
   0x8   : > { %p97_p0 = scmp.ne.s32.totalorder %s937_s18, %s933_s0  ;;  %p1029_p1 = scmp.eq.s32.totalorder %s683_s22, 0 }
   0x9   : > { %p1033_p2 = scmp.eq.s32.totalorder %s683_s22, 1  ;;  %p217_p3 = scmp.eq.s32.totalorder %s684_s23, 1 }
   0xa   : > { %s1225_s24 = scalar_select %p1029_p1, 1, 0 }
   0xb   : > { %s1226_s25 = scalar_select %p1033_p2, 1, 0 }
   0xc   : > { %p1039_p4 = por %p1029_p1, %p97_p0  ;;  %p685_p5 = scmp.ge.s32.totalorder %s953_s21, 1 }
   0xd   : > { %p1044_p6 = por %p217_p3, %p97_p0  ;;  %p224_p7 = scmp.lt.s32.totalorder %s953_s21, 3 }
   0xe   : > { %s1227_s26 = scalar_select %p1039_p4, 1, 0 }
   0xf   : > { %s1228_s27 = scalar_select %p1044_p6, 1, 0 }
  0x10   : > { %p1049_p8 = pnand %p685_p5, %p224_p7  ;;  %s955_s29 = smov [#allocation5]  }
  0x11   : > { %s239_s30 = sshll.u32 %s955_s29, 4  ;;  %s41_s7 = sadd.s32 1, %s949_s20  ;;  %s240_s30 = int_to_ptr.vmem [resolvable:$true] %s239_s30 }
  0x12   : > { %s1229_s28 = scalar_select %p1049_p8, 1, 0 }
  0x13   : > { %p725_p10 = pneg %p1049_p8  ;;  %s84_s8 = sadd.s32 1, %s941_s19 }
  0x14   : > { %p1064_p12 = scmp.ge.s32.totalorder %s41_s7, 2  ;;  %s809_s12 = scalar_lea.hbm %s1218_s3, 128 }
  0x15   : > { %p1058_p11 = pnand %p725_p10, %p1029_p1  ;;  %p810_p13 = scmp.ne.s32.totalorder %s1218_s3, %s809_s12 }
  0x16   : > { %s1231_s9 = scalar_select %p1064_p12, 1, 0 }
  0x17   : > { %p811_p0 = pneg %p1058_p11  ;;  %p816_p7 = scmp.lt.u32.totalorder %s809_s12, %s1218_s3 }
  0x19   : > { %p812_p3 = pnand %p811_p0, %p810_p13 }
  0x1b   : > { %p813_p5 = pneg %p812_p3 }
  0x1d   : > { %p818_p10 = pnand %p816_p7, %p813_p5 }
  0x1f   : > { %821 = shalt.err (!%p818_p10)
}
  0x20   : > { %s822_s17 = scalar_lea.vmem %s240_s30, 128  ;;  %p830_p4 = scmp.lt.s32.totalorder %s240_s30, %s240_s30 }
  0x21   : > { %p823_p9 = scmp.ne.s32.totalorder %s240_s30, %s822_s17  ;;  %p831_p8 = scmp.lt.s32.totalorder %s822_s17, %s822_s17 }
  0x23   : > { %p825_p6 = pnand %p823_p9, %p811_p0  ;;  %p832_p2 = por %p831_p8, %p830_p4 }
  0x25   : > { %p826_p1 = pneg %p825_p6 }
  0x27   : > { %p833_p12 = pnand %p832_p2, %p826_p1 }
  0x29   : > { %836 = shalt.err (!%p833_p12)
}
  0x2a   : > { %728 = dma.hbm_to_vmem [thread:$0]  (!%p1058_p11), %s1218_s3, 128, %s240_s30, [#allocation6]  }
  0x2b   : > { %p1232_p4 = scmp.ne.s32.totalorder %s1231_s9, 0  ;;  %p91_p1 = scmp.ne.s32.totalorder %s941_s19, %s937_s18 }
  0x2c   : > { %p92_p2 = scmp.eq.s32.totalorder %s953_s21, 0  ;;  %p738_p6 = scmp.lt.s32.totalorder %s953_s21, 2 }
  0x2d   : > { %s1247_s7 = smov (%p1232_p4, %s41_s7), 0  ;;  %p1233_p12 = scmp.ne.s32.totalorder %s1226_s25, 0 }
  0x2e   : > { %s79_s29 = ssub.s32 %s949_s20, %s1247_s7  ;;  %p93_p9 = por %p92_p2, %p91_p1 }
  0x2f   : > { %p82_p8 = scmp.eq.s32.totalorder %s79_s29, 0  ;;  %p1096_p13 = por %p1233_p12, %p91_p1 }
  0x30   : > { %s273_s10 = sand.u32 1, %s941_s19   ;;  %s690_s9 = sshll.u32 %s949_s20, 6 }
  0x31   : > { %s1104_s11 = scalar_select %p82_p8, %s941_s19, %s84_s8  }
  0x32   : > { %s689_s30 = sshll.u32 %s273_s10, 2  ;;  %s1110_s14 = scalar_lea.hbm %s1216_s1, %s690_s9 }
  0x33   : > { %s277_s25 = scalar_lea.vmem [#allocation2], %s689_s30  ;;  %p1114_p11 = pnand %p738_p6, %p93_p9 }
  0x34   : > { %s285_s15 = sshll.u32 %s277_s25, 4  ;;  %s274_s8 = scalar_lea.sflag [#allocation3], %s273_s10  ;;  %s1112_s15 = int_to_ptr.vmem [resolvable:$true] %s285_s15 }
  0x35   : > { %s837_s17 = scalar_lea.hbm %s1110_s14, 64  ;;  %p839_p3 = pneg %p1114_p11 }
  0x36   : > { %p838_p0 = scmp.ne.s32.totalorder %s1110_s14, %s837_s17  ;;  %s842_s29 = scalar_lea.hbm %s1216_s1, 128 }
  0x37   : > { %p843_p10 = scmp.lt.u32.totalorder %s1110_s14, %s1216_s1  ;;  %p844_p4 = scmp.lt.u32.totalorder %s842_s29, %s837_s17 }
  0x38   : > { %p840_p5 = pnand %p839_p3, %p838_p0  ;;  %p846_p2 = scmp.lt.u32.totalorder %s837_s17, %s1110_s14 }
  0x39   : > { %p845_p1 = por %p844_p4, %p843_p10 }
  0x3a   : > { %p841_p7 = pneg %p840_p5 }
  0x3b   : > { %p847_p6 = por %p846_p2, %p845_p1 }
  0x3d   : > { %p848_p8 = pnand %p847_p6, %p841_p7 }
  0x3f   : > { %851 = shalt.err (!%p848_p8)
}
  0x40   : > { %s852_s10 = scalar_lea.vmem %s1112_s15, 64  ;;  %s956_s12 = smov [#allocation2]  }
  0x41   : > { %p853_p9 = scmp.ne.s32.totalorder %s1112_s15, %s852_s10  ;;  %s857_s13 = sshll.u32 %s956_s12, 4  ;;  %s858_s13 = int_to_ptr.vmem [resolvable:$false] %s857_s13 }
  0x42   : > { %s859_s25 = scalar_lea.vmem %s858_s13, 128  ;;  %p860_p5 = scmp.lt.s32.totalorder %s1112_s15, %s858_s13 }
  0x43   : > { %p855_p12 = pnand %p853_p9, %p839_p3  ;;  %p861_p10 = scmp.lt.s32.totalorder %s859_s25, %s852_s10 }
  0x45   : > { %p856_p0 = pneg %p855_p12  ;;  %p862_p4 = por %p861_p10, %p860_p5 }
  0x47   : > { %p863_p1 = pnand %p862_p4, %p856_p0 }
  0x49   : > { %866 = shalt.err (!%p863_p1)
}
  0x4a   : > { %732 = dma.hbm_to_vmem [thread:$0]  (!%p1114_p11), %s1110_s14, 64, %s1112_s15, %s274_s8  }
  0x4b   : > { %p1236_p7 = scmp.ne.s32.totalorder %s1229_s28, 0 }
  0x4c   : > { %s1146_s17 = sand.u32 (!%p1236_p7), 1, %s937_s18   ;;  %p1237_p3 = scmp.ne.s32.totalorder (!%p1236_p7), %s1227_s26, 0 }
  0x4d   : > { %310 = sbr.rel (%p1236_p7) target bundleno = 447 (0x1bf), region = 40  ;;  %s692_s22 = sshll.u32 (!%p1236_p7), %s1146_s17, 2 }
  0x4e   : > { %s313_s23 = scalar_lea.sflag (!%p1236_p7), [#allocation3], %s1146_s17  ;;  %s316_s29 = scalar_lea.vmem (!%p1236_p7), [#allocation2], %s692_s22 }
  0x54   : > { %920 = dma.done.wait (%p1237_p3), %s313_s23, 64  }
  0x55   : > { %922 = vsyncadd (%p1237_p3), %s313_s23, 4294967232  ;;  %p1238_p2 = scmp.ne.s32.totalorder %s1225_s24, 0 }
  0x57   : > { %924 = dma.done.wait (%p1238_p2), [#allocation6], 128  }
  0x58   : > { %926 = vsyncadd (%p1238_p2), [#allocation6], 4294967168  ;;  %v957_v0 = vmov 0.0|0.0   ;;  %v401_v1 = vld [vmem:[%s316_s29] sm:$0xf]  ;;  %vm958_vm0 = vmmov 0  }
  0x59   : > { %713 = vmatprep.subr.bf16.mxu0 %v957_v0  ;;  %v959_v2 = vmov 0.0   ;;  %v441_v4 = vld [vmem:[%s1219_s4] sm:$0xff]  ;;  %s960_s15 = smov 1   ;;  %v961_v6 = vmov 0   ;;  %s962_s24 = smov 127   ;;  %vm425_vm1 = vcmask 7168  }
  0x5a   : > { %710 = vmatprep.mubr.msk.f32.mxu0 %vm958_vm0, %v959_v2  ;;  %v797_v3 = vpack.i.bf16 %v401_v1, %v959_v2  ;;  %v802_v5 = vpack.i.bf16 %v959_v2, %v401_v1  ;;  %807 = vset.pattern.permute.xlu1 %v961_v6  ;;  %v436_v10 = vrot.slane %v401_v1, 4  ;;  %vm434_vm2 = vcmask 1039360   ;;  %v440_v18 = vld [vmem:[#allocation5] sm:$0xff]  ;;  %s694_s26 = sshll.u32 %s1146_s17, 3  ;;  %s700_s16 = sshll.u32 %s945_s2, 7 }
  0x5b   : > { %444 = vperm.xlu1 %807, %v441_v4   ;;  %808 = vset.pattern.permute.xlu0 %v961_v6  ;;  %vm438_vm3 = vcmask 1043456   ;;  %vm963_vm4 = vmmov 1   ;;  %vm447_vm6 = vcmask 97280   ;;  %s370_s8 = scalar_lea.vmem [#allocation7], %s694_s26  ;;  %vm524_vm7 = vcmask 130048   ;;  %s1166_s12 = scalar_lea.hbm %s1220_s5, %s700_s16 }
  0x5c   : > { %798 = vrot.lane.b32.xlu0 %v797_v3, %s960_s15  ;;  %vm715_vm5 = vmpackc.low %vm438_vm3, %vm963_vm4  ;;  %s542_s30 = sshll.u32 %s370_s8, 4  ;;  %s527_s13 = scalar_lea.sflag [#allocation4], %s1146_s17  ;;  %s1168_s30 = int_to_ptr.vmem [resolvable:$true] %s542_s30 }
  0x5d   : > { %s867_s25 = scalar_lea.vmem %s1168_s30, 128  ;;  %s964_s2 = smov [#allocation7]  }
  0x5e   : > { %p868_p11 = scmp.ne.s32.totalorder %s1168_s30, %s867_s25  ;;  %s871_s22 = sshll.u32 %s964_s2, 4  ;;  %s872_s22 = int_to_ptr.vmem [resolvable:$false] %s871_s22 }
  0x5f   : > { %s873_s23 = scalar_lea.vmem %s872_s22, 256  ;;  %p874_p9 = scmp.lt.s32.totalorder %s1168_s30, %s872_s22 }
  0x60   : > { %803 = vrot.lane.b32.xlu0 %v802_v5, %s962_s24  ;;  %p869_p6 = pnand %p868_p11, %p1096_p13  ;;  %p875_p12 = scmp.lt.s32.totalorder %s873_s23, %s867_s25 }
  0x62   : > { %p870_p8 = pneg %p869_p6  ;;  %p876_p0 = por %p875_p12, %p874_p9 }
  0x64   : > { %p877_p5 = pnand %p876_p0, %p870_p8 }
  0xce   : > { %v799_v7 = vpop.permute.xlu0 %798 }
  0xcf   : > { %v801_v8 = vunpack.i.h.bf16 %v799_v7  ;;  %v800_v9 = vunpack.i.l.bf16 %v799_v7 }
  0xd1   : > { %v426_v11 = vsel %vm425_vm1, %v800_v9, %v801_v8 }
  0xd2   : > { %v804_v12 = vpop.permute.xlu0 %803  ;;  %v439_v16 = vsel %vm438_vm3, %v426_v11, %v436_v10 }
  0xd3   : > { %v806_v13 = vunpack.i.h.bf16 %v804_v12  ;;  %v805_v14 = vunpack.i.l.bf16 %v804_v12 }
  0xd5   : > { %v435_v15 = vsel %vm434_vm2, %v805_v14, %v806_v13 }
  0xd6   : > { %v714_v17 = vpack.c.bf16 %v435_v15, %v439_v16 }
  0xd8   : > { %716 = vmatpush3.bf16.msk.msra.mxu0 %vm715_vm5, %v714_v17 }
  0xda   : > { %v445_v19 = vpop.permute.xlu1 %444 }
  0xdb   : > { %711 = vmatmul.mubr.msk.f32.vlgmr.msra.gmra.mrb[0].mxu0 %vm447_vm6, %v440_v18 }
 0x1ae   : > { %v520_v20 = vpop.f32.mrb[0].mxu0 }
 0x1af   : > { %v521_v21 = vadd.f32 %v520_v20, %v445_v19  ;;  %v712_v22 = vpop.f32.mrb[1].mxu0 }
 0x1b1   : > { %525 = vst.msk [vmem:[%s370_s8] sm:$0xff] %vm524_vm7, %v521_v21 }
 0x1b2   : > { %880 = shalt.err (!%p877_p5)
}
 0x1b3   : > { %s881_s17 = scalar_lea.hbm %s1166_s12, 128  ;;  %s885_s14 = scalar_lea.hbm %s1220_s5, 256 }
 0x1b4   : > { %p882_p10 = scmp.ne.s32.totalorder %s1166_s12, %s881_s17  ;;  %p886_p7 = scmp.lt.u32.totalorder %s1166_s12, %s1220_s5 }
 0x1b5   : > { %p887_p3 = scmp.lt.u32.totalorder %s885_s14, %s881_s17  ;;  %p889_p11 = scmp.lt.u32.totalorder %s881_s17, %s1166_s12 }
 0x1b6   : > { %p883_p4 = pnand %p882_p10, %p1096_p13 }
 0x1b7   : > { %p888_p2 = por %p887_p3, %p886_p7 }
 0x1b8   : > { %p884_p1 = pneg %p883_p4 }
 0x1b9   : > { %p890_p6 = por %p889_p11, %p888_p2 }
 0x1bb   : > { %p891_p8 = pnand %p890_p6, %p884_p1 }
 0x1bd   : > { %894 = shalt.err (!%p891_p8)
}
 0x1be   : > { %723 = dma.vmem_to_hbm [thread:$0]  (%p1096_p13), %s1168_s30, 128, %s1166_s12, %s527_s13  }
 0x1bf PF: > { %s554_s26 = sand.u32 1, %s933_s0   ;;  %p1239_p9 = scmp.ne.s32.totalorder %s1228_s27, 0 }
 0x1c0   : > { %p1240_p12 = scmp.ge.s32.totalorder %s953_s21, 2  ;;  %s555_s16 = scalar_lea.sflag [#allocation4], %s554_s26 }
 0x1c2   : > { %p734_p0 = pnand %p1240_p12, %p1239_p9 }
 0x1c4   : > { %928 = dma.done.wait (!%p734_p0), %s555_s16, 128  }
 0x1c5   : > { %930 = vsyncadd (!%p734_p0), %s555_s16, 4294967168  ;;  %s22_s21 = sadd.s32 1, %s953_s21   ;;  %s1241_s0 = smov %s937_s18 }
 0x1c6   : > { %p19_p5 = scmp.ge.s32.totalorder %s22_s21, 4   ;;  %s1242_s18 = smov %s941_s19 }
 0x1c7   : > { %s1243_s19 = smov %s1104_s11  ;;  %s1244_s2 = smov %s949_s20 }
 0x1c8   : > { %s1245_s20 = smov %s1247_s7  ;;  %21 = sbr.rel (!%p19_p5) target bundleno = 7 (0x7), region = 99 }
 0x1cf   :  { %560 = vsyncpa [#allocation3], 1 }
 0x1d0   :  { %562 = vsyncpa [#allocation3 + $0x1], 1 }
 0x1d1   :  { %563 = vsyncpa [#allocation6], 1 }
 0x1d2   :  { %564 = vsyncpa [#allocation4], 1 }
 0x1d3   :  { %566 = vsyncpa [#allocation4 + $0x1], 1 }

</bundles_post_ra>
